<compile_context>
chip_gen: v5e
topology: v5e:2x2
jax: 0.10.0
libtpu: 0.0.40
codegen_flags: <defaults>
</compile_context>

<pallas_src>
import functools

import jax
import jax.numpy as jnp
from jax import lax
from jax.experimental import pallas as pl
from jax.experimental.pallas import tpu as pltpu


def _round_up(x, m):
    return (x + m - 1) // m * m


def basic_conv2d(x_nchw, weight, bias, *, stride=1, padding=0,
                 batch_tile=128, out_align=128, out_dtype=None,
                 vmem_limit_bytes=None):
    """Forward of BasicConv2D: ReLU(Conv2d(x) + bias).

    x_nchw : (N, C, H, W)    float32 (PyTorch layout)
    weight : (O, C, KH, KW)  float32 (PyTorch Conv2d weight layout)
    bias   : (O,)            float32

    batch_tile : images per grid step (MXU rows per step = Wo * batch_tile).
    out_align  : output-channel padding multiple (128; use 256 on v6e/v7x
                 when O > 128 to fill the 256-wide MXU).
    out_dtype  : kernel writeback dtype (default: x dtype); jnp.bfloat16
                 halves writeback bytes in a bf16 network.
    vmem_limit_bytes : raise the scoped VMEM limit when sweeping batch_tile
                 (e.g. 64<<20 on v5e/v6e; stay below ~48<<20 on v7x).
    """
    N, C, H, W = x_nchw.shape
    O, Cw, KH, KW = weight.shape
    assert Cw == C, (Cw, C)

    Hp, Wp = H + 2 * padding, W + 2 * padding
    Ho = (Hp - KH) // stride + 1
    Wo = (Wp - KW) // stride + 1
    out_dtype = x_nchw.dtype if out_dtype is None else out_dtype

    tn = max(1, min(batch_tile, N))
    Npad = _round_up(N, tn)
    NT = Npad // tn
    Opad = _round_up(O, out_align)
    R = Wo * tn                      # matmul rows per grid step

    # ---- wrapper-side layout plumbing (fuses under jit, no FLOPs) ----------
    # x: NCHW -> zero-padded (NT*Hp, Wp, tn, C), bf16 MXU operand.
    x = jnp.transpose(x_nchw, (0, 2, 3, 1))                       # NHWC
    x = jnp.pad(x, ((0, Npad - N), (padding, padding),
                    (padding, padding), (0, 0)))
    x = x.reshape(NT, tn, Hp, Wp, C)
    x = jnp.transpose(x, (0, 2, 3, 1, 4))                         # (NT,Hp,Wp,tn,C)
    x = x.reshape(NT * Hp, Wp, tn, C).astype(jnp.bfloat16)

    # weight: (O,C,KH,KW) -> (KH*KW, C, Opad) bf16; bias -> (1, Opad) f32.
    # Padded output channels get zero weight + zero bias -> exact zeros,
    # sliced off below.
    w = jnp.transpose(weight, (2, 3, 1, 0))                       # (KH,KW,C,O)
    w = jnp.pad(w, ((0, 0), (0, 0), (0, 0), (0, Opad - O)))
    w = w.reshape(KH * KW, C, Opad).astype(jnp.bfloat16)
    b = jnp.pad(bias, (0, Opad - O)).astype(jnp.float32).reshape(1, Opad)

    def kernel(x_ref, w_ref, b_ref, o_ref, acc_ref):
        # x_ref  : (1, Wp, tn, C)    bf16 -- one padded input row, one batch tile
        # w_ref  : (KH*KW, C, Opad)  bf16 -- full weight, VMEM-resident
        # b_ref  : (1, Opad)         f32
        # o_ref  : (1, R, Opad)      out_dtype (lane-dense contiguous slab)
        # acc_ref: (R, Opad)         f32 accumulator across the KH taps
        kh = pl.program_id(2)

        @pl.when(kh == 0)
        def _init():
            acc_ref[...] = jnp.zeros_like(acc_ref)

        acc = acc_ref[...]
        for kw in range(KW):                          # static, unrolled
            if stride == 1:
                xs = x_ref[0, kw:kw + Wo, :, :]       # (Wo, tn, C)
            else:
                # TODO(synk): stride > 1 path is implemented but not exercised
                # by the test below; validate before relying on it.
                xs = x_ref[0, pl.ds(kw, Wo, stride), :, :]
            acc = acc + jnp.dot(xs.reshape(R, C), w_ref[kh * KW + kw],
                                preferred_element_type=jnp.float32)
        acc_ref[...] = acc

        @pl.when(kh == KH - 1)
        def _finalize():
            res = acc_ref[...] + b_ref[...]                        # bias (f32)
            o_ref[0] = jnp.maximum(res, 0.0).astype(o_ref.dtype)   # ReLU

    out = pl.pallas_call(
        kernel,
        out_shape=jax.ShapeDtypeStruct((NT * Ho, R, Opad), out_dtype),
        grid=(NT, Ho, KH),                  # KH = reduction axis, innermost
        in_specs=[
            # one padded input row per step, indexed directly in HBM
            # (no im2col copy); block size 1 on the row axis => element index.
            pl.BlockSpec((1, Wp, tn, C),
                         lambda i, ho, kh: (i * Hp + ho * stride + kh, 0, 0, 0)),
            # full weight + bias resident (constant index map -> DMA'd once).
            # v7x: optionally add pipeline_mode=pl.Buffered(1) to single-buffer.
            pl.BlockSpec((KH * KW, C, Opad), lambda i, ho, kh: (0, 0, 0)),
            pl.BlockSpec((1, Opad), lambda i, ho, kh: (0, 0)),
        ],
        out_specs=pl.BlockSpec((1, R, Opad),
                               lambda i, ho, kh: (i * Ho + ho, 0, 0)),
        scratch_shapes=[pltpu.VMEM((R, Opad), jnp.float32)],
        compiler_params=pltpu.CompilerParams(
            dimension_semantics=("parallel", "parallel", "arbitrary"),
            vmem_limit_bytes=vmem_limit_bytes,
        ),
    )(x, w, b)

    # (NT*Ho, Wo*tn, Opad) -> (N, O, Ho, Wo)  (PyTorch NCHW output layout)
    out = out.reshape(NT, Ho, Wo, tn, Opad)[..., :O]
    out = jnp.transpose(out, (0, 3, 4, 1, 2)).reshape(Npad, O, Ho, Wo)
    return out[:N].astype(out_dtype)


def reference_conv_relu(x_nchw, weight, bias, *, stride=1, padding=0):
    out = lax.conv_general_dilated(
        x_nchw, weight,
        window_strides=(stride, stride),
        padding=((padding, padding), (padding, padding)),
        dimension_numbers=("NCHW", "OIHW", "NCHW"))
    return jnp.maximum(out + bias.reshape(1, -1, 1, 1), 0.0)


if __name__ == "__main__":
    key = jax.random.PRNGKey(0)
    kx, k1, k2, k3, k4 = jax.random.split(key, 5)

    N, C, H, W = 2, 4, 16, 16
    x = jax.random.normal(kx, (N, C, H, W), dtype=jnp.float32)

    def init(kw_key, kb_key, O, C, KH, KW):
        bound = 1.0 / float((C * KH * KW) ** 0.5)
        w = jax.random.uniform(kw_key, (O, C, KH, KW), minval=-bound,
                               maxval=bound, dtype=jnp.float32)
        b = jax.random.uniform(kb_key, (O,), minval=-bound, maxval=bound,
                               dtype=jnp.float32)
        return w, b

    # BasicConv2D(in_channels=4, out_channels=8, kernel_size=3, padding=1)
    w3, b3 = init(k1, k2, 8, C, 3, 3)
    conv3 = jax.jit(functools.partial(basic_conv2d, stride=1, padding=1))
    out3 = jax.block_until_ready(conv3(x, w3, b3))
    ref3 = reference_conv_relu(x, w3, b3, stride=1, padding=1)
    assert out3.shape == (N, 8, H, W), out3.shape
    err3 = float(jnp.max(jnp.abs(out3 - ref3)))
    # bf16 MXU operands (f32 accumulate) -> looser tolerance than pure f32.
    assert jnp.allclose(out3, ref3, atol=5e-2, rtol=5e-2), f"3x3 mismatch: {err3}"

    # BasicConv2D(in_channels=4, out_channels=16, kernel_size=1)
    w1, b1 = init(k3, k4, 16, C, 1, 1)
    conv1 = jax.jit(functools.partial(basic_conv2d, stride=1, padding=0))
    out1 = jax.block_until_ready(conv1(x, w1, b1))
    ref1 = reference_conv_relu(x, w1, b1, stride=1, padding=0)
    assert out1.shape == (N, 16, H, W), out1.shape
    err1 = float(jnp.max(jnp.abs(out1 - ref1)))
    assert jnp.allclose(out1, ref1, atol=5e-2, rtol=5e-2), f"1x1 mismatch: {err1}"

    print("KERNEL_OK")
</pallas_src>

<mosaic_0001>
module attributes {stable_mosaic.version = 11 : i64} {
  func.func @kernel(%arg0: i32, %arg1: i32, %arg2: i32, %arg3: memref<1x18x2x4xbf16, #tpu.memory_space<vmem>>, %arg4: memref<9x4x128xbf16, #tpu.memory_space<vmem>>, %arg5: memref<1x128xf32, #tpu.memory_space<vmem>>, %arg6: memref<1x32x128xf32, #tpu.memory_space<vmem>>, %arg7: memref<32x128xf32, #tpu.memory_space<vmem>>) attributes {dimension_semantics = [#tpu.dimension_semantics<parallel>, #tpu.dimension_semantics<parallel>, #tpu.dimension_semantics<arbitrary>], iteration_bounds = array<i64: 1, 16, 3>, scalar_prefetch = 0 : i64, scratch_operands = 1 : i64, tpu.core_type = #tpu.core_type<tc>, window_params = [{transform_indices = @transform_0, window_bounds = array<i64: 1, 18, 2, 4>}, {pipeline_mode = #tpu.pipeline_mode<synchronous>, transform_indices = @transform_1, window_bounds = array<i64: 9, 4, 128>}, {pipeline_mode = #tpu.pipeline_mode<synchronous>, transform_indices = @transform_2, window_bounds = array<i64: 1, 128>}, {transform_indices = @transform_3, window_bounds = array<i64: 1, 32, 128>}]} {
    %c0_i32 = arith.constant 0 : i32
    %0 = arith.cmpi eq, %arg2, %c0_i32 : i32
    %1 = arith.extui %0 : i1 to i32
    %c0_i32_0 = arith.constant 0 : i32
    %2 = arith.cmpi ne, %1, %c0_i32_0 : i32
    scf.if %2 {
      %cst_27 = arith.constant 0.000000e+00 : f32
      %38 = vector.broadcast %cst_27 : f32 to vector<32x128xf32>
      %c0_28 = arith.constant 0 : index
      %c0_29 = arith.constant 0 : index
      %39 = vector.load %arg7[%c0_28, %c0_29] : memref<32x128xf32, #tpu.memory_space<vmem>>, vector<32x128xf32>
      tpu.vector_store %arg7[%c0_28, %c0_29], %38 {strides = array<i32>} : memref<32x128xf32, #tpu.memory_space<vmem>>, vector<32x128xf32>,
    } else {
    }
    %c0 = arith.constant 0 : index
    %c0_1 = arith.constant 0 : index
    %3 = vector.load %arg7[%c0, %c0_1] : memref<32x128xf32, #tpu.memory_space<vmem>>, vector<32x128xf32>
    %c0_2 = arith.constant 0 : index
    %c0_3 = arith.constant 0 : index
    %c0_4 = arith.constant 0 : index
    %c0_5 = arith.constant 0 : index
    %4 = vector.load %arg3[%c0_2, %c0_3, %c0_4, %c0_5] : memref<1x18x2x4xbf16, #tpu.memory_space<vmem>>, vector<1x16x2x4xbf16>
    %5 = vector.shape_cast %4 : vector<1x16x2x4xbf16> to vector<16x2x4xbf16>
    %6 = vector.shape_cast %5 : vector<16x2x4xbf16> to vector<32x4xbf16>
    %c3_i32 = arith.constant 3 : i32
    %7 = arith.muli %arg2, %c3_i32 : i32
    %c0_i32_6 = arith.constant 0 : i32
    %8 = arith.addi %7, %c0_i32_6 : i32
    %9 = arith.index_cast %8 : i32 to index
    %c0_7 = arith.constant 0 : index
    %c0_8 = arith.constant 0 : index
    %10 = vector.load %arg4[%9, %c0_7, %c0_8] : memref<9x4x128xbf16, #tpu.memory_space<vmem>>, vector<1x4x128xbf16>
    %11 = vector.shape_cast %10 : vector<1x4x128xbf16> to vector<4x128xbf16>
    %cst = arith.constant dense<0.000000e+00> : vector<32x128xf32>
    %12 = tpu.matmul %6, %11, %cst {dimension_numbers = #tpu.dot_dimension_numbers<[1], [0], [0], [1], [0, 0, 1, 1], [], []>} : vector<32x4xbf16>, vector<4x128xbf16>, vector<32x128xf32> -> vector<32x128xf32>
    %13 = arith.addf %3, %12 : vector<32x128xf32>
    %c0_9 = arith.constant 0 : index
    %c1 = arith.constant 1 : index
    %c0_10 = arith.constant 0 : index
    %c0_11 = arith.constant 0 : index
    %14 = vector.load %arg3[%c0_9, %c1, %c0_10, %c0_11] : memref<1x18x2x4xbf16, #tpu.memory_space<vmem>>, vector<1x16x2x4xbf16>
    %15 = vector.shape_cast %14 : vector<1x16x2x4xbf16> to vector<16x2x4xbf16>
    %16 = vector.shape_cast %15 : vector<16x2x4xbf16> to vector<32x4xbf16>
    %c3_i32_12 = arith.constant 3 : i32
    %17 = arith.muli %arg2, %c3_i32_12 : i32
    %c1_i32 = arith.constant 1 : i32
    %18 = arith.addi %17, %c1_i32 : i32
    %19 = arith.index_cast %18 : i32 to index
    %c0_13 = arith.constant 0 : index
    %c0_14 = arith.constant 0 : index
    %20 = vector.load %arg4[%19, %c0_13, %c0_14] : memref<9x4x128xbf16, #tpu.memory_space<vmem>>, vector<1x4x128xbf16>
    %21 = vector.shape_cast %20 : vector<1x4x128xbf16> to vector<4x128xbf16>
    %cst_15 = arith.constant dense<0.000000e+00> : vector<32x128xf32>
    %22 = tpu.matmul %16, %21, %cst_15 {dimension_numbers = #tpu.dot_dimension_numbers<[1], [0], [0], [1], [0, 0, 1, 1], [], []>} : vector<32x4xbf16>, vector<4x128xbf16>, vector<32x128xf32> -> vector<32x128xf32>
    %23 = arith.addf %13, %22 : vector<32x128xf32>
    %c0_16 = arith.constant 0 : index
    %c2 = arith.constant 2 : index
    %c0_17 = arith.constant 0 : index
    %c0_18 = arith.constant 0 : index
    %24 = vector.load %arg3[%c0_16, %c2, %c0_17, %c0_18] : memref<1x18x2x4xbf16, #tpu.memory_space<vmem>>, vector<1x16x2x4xbf16>
    %25 = vector.shape_cast %24 : vector<1x16x2x4xbf16> to vector<16x2x4xbf16>
    %26 = vector.shape_cast %25 : vector<16x2x4xbf16> to vector<32x4xbf16>
    %c3_i32_19 = arith.constant 3 : i32
    %27 = arith.muli %arg2, %c3_i32_19 : i32
    %c2_i32 = arith.constant 2 : i32
    %28 = arith.addi %27, %c2_i32 : i32
    %29 = arith.index_cast %28 : i32 to index
    %c0_20 = arith.constant 0 : index
    %c0_21 = arith.constant 0 : index
    %30 = vector.load %arg4[%29, %c0_20, %c0_21] : memref<9x4x128xbf16, #tpu.memory_space<vmem>>, vector<1x4x128xbf16>
    %31 = vector.shape_cast %30 : vector<1x4x128xbf16> to vector<4x128xbf16>
    %cst_22 = arith.constant dense<0.000000e+00> : vector<32x128xf32>
    %32 = tpu.matmul %26, %31, %cst_22 {dimension_numbers = #tpu.dot_dimension_numbers<[1], [0], [0], [1], [0, 0, 1, 1], [], []>} : vector<32x4xbf16>, vector<4x128xbf16>, vector<32x128xf32> -> vector<32x128xf32>
    %33 = arith.addf %23, %32 : vector<32x128xf32>
    %c0_23 = arith.constant 0 : index
    %c0_24 = arith.constant 0 : index
    %34 = vector.load %arg7[%c0_23, %c0_24] : memref<32x128xf32, #tpu.memory_space<vmem>>, vector<32x128xf32>
    tpu.vector_store %arg7[%c0_23, %c0_24], %33 {strides = array<i32>} : memref<32x128xf32, #tpu.memory_space<vmem>>, vector<32x128xf32>,
    %c2_i32_25 = arith.constant 2 : i32
    %35 = arith.cmpi eq, %arg2, %c2_i32_25 : i32
    %36 = arith.extui %35 : i1 to i32
    %c0_i32_26 = arith.constant 0 : i32
    %37 = arith.cmpi ne, %36, %c0_i32_26 : i32
    scf.if %37 {
      %c0_27 = arith.constant 0 : index
      %c0_28 = arith.constant 0 : index
      %38 = vector.load %arg7[%c0_27, %c0_28] : memref<32x128xf32, #tpu.memory_space<vmem>>, vector<32x128xf32>
      %c0_29 = arith.constant 0 : index
      %c0_30 = arith.constant 0 : index
      %39 = vector.load %arg5[%c0_29, %c0_30] : memref<1x128xf32, #tpu.memory_space<vmem>>, vector<1x128xf32>
      %40 = vector.broadcast %39 : vector<1x128xf32> to vector<32x128xf32>
      %41 = arith.addf %38, %40 : vector<32x128xf32>
      %cst_31 = arith.constant 0.000000e+00 : f32
      %42 = vector.broadcast %cst_31 : f32 to vector<32x128xf32>
      %43 = arith.maximumf %41, %42 : vector<32x128xf32>
      %c0_32 = arith.constant 0 : index
      %c0_33 = arith.constant 0 : index
      %c0_34 = arith.constant 0 : index
      %44 = vector.load %arg6[%c0_32, %c0_33, %c0_34] : memref<1x32x128xf32, #tpu.memory_space<vmem>>, vector<1x32x128xf32>
      %45 = vector.shape_cast %44 : vector<1x32x128xf32> to vector<32x128xf32>
      %46 = vector.shape_cast %43 : vector<32x128xf32> to vector<1x32x128xf32>
      tpu.vector_store %arg6[%c0_32, %c0_33, %c0_34], %46 {strides = array<i32>} : memref<1x32x128xf32, #tpu.memory_space<vmem>>, vector<1x32x128xf32>,
    } else {
    }
    return
  }
  func.func @transform_0(%arg0: i32, %arg1: i32, %arg2: i32) -> (i32, i32, i32, i32) {
    %c18_i32 = arith.constant 18 : i32
    %0 = arith.muli %arg0, %c18_i32 : i32
    %c1_i32 = arith.constant 1 : i32
    %1 = arith.muli %arg1, %c1_i32 : i32
    %2 = arith.addi %0, %1 : i32
    %3 = arith.addi %2, %arg2 : i32
    %c0_i32 = arith.constant 0 : i32
    %c0_i32_0 = arith.constant 0 : i32
    %c0_i32_1 = arith.constant 0 : i32
    %c0_i32_2 = arith.constant 0 : i32
    return %3, %c0_i32, %c0_i32_0, %c0_i32_1 : i32, i32, i32, i32
  }
  func.func @transform_1(%arg0: i32, %arg1: i32, %arg2: i32) -> (i32, i32, i32) {
    %c0_i32 = arith.constant 0 : i32
    %c0_i32_0 = arith.constant 0 : i32
    %c0_i32_1 = arith.constant 0 : i32
    %c0_i32_2 = arith.constant 0 : i32
    return %c0_i32, %c0_i32_0, %c0_i32_1 : i32, i32, i32
  }
  func.func @transform_2(%arg0: i32, %arg1: i32, %arg2: i32) -> (i32, i32) {
    %c0_i32 = arith.constant 0 : i32
    %c0_i32_0 = arith.constant 0 : i32
    %c0_i32_1 = arith.constant 0 : i32
    return %c0_i32, %c0_i32_0 : i32, i32
  }
  func.func @transform_3(%arg0: i32, %arg1: i32, %arg2: i32) -> (i32, i32, i32) {
    %c16_i32 = arith.constant 16 : i32
    %0 = arith.muli %arg0, %c16_i32 : i32
    %1 = arith.addi %0, %arg1 : i32
    %c0_i32 = arith.constant 0 : i32
    %c0_i32_0 = arith.constant 0 : i32
    %c0_i32_1 = arith.constant 0 : i32
    return %1, %c0_i32, %c0_i32_0 : i32, i32, i32
  }
}

</mosaic_0001>

<bundles_post_ra>
// kernel: basic_conv2d.1
= control target key start
LH: loop header
LB: loop body
LE: loop exit
PB: predicated region body
PF: predicated region fallthrough
CT: control target
= control target key end

     0   :  { %s783_s12 = smov 0   ;;  %s785_s13 = smov 0   ;;  %s911_s0 = inlined_call_operand.vmem [shape: bf16[18,18,2,4], index: 0, kind: input, shape index: {}]   ;;  %s912_s1 = inlined_call_operand.vmem [shape: bf16[9,4,128], index: 1, kind: input, shape index: {}]   ;;  %s913_s2 = inlined_call_operand.vmem [shape: f32[1,128], index: 2, kind: input, shape index: {}]   ;;  %s914_s3 = inlined_call_operand.vmem [shape: f32[16,32,128], index: 3, kind: output, shape index: {}]  }
   0x1   :  { %s787_s14 = smov 0   ;;  %s789_s15 = smov 0  }
   0x2   :  { %s791_s16 = smov 0  }
   0x3 LB: > { %s25_s17 = sadd.s32 1, %s752_s14  ;;  %s28_s18 = sadd.s32 1, %s756_s15  ;;  %s760_s16 = sphi %s791_s16, %s13_s16   ;;  %s756_s15 = sphi %s789_s15, %s918_s15   ;;  %s752_s14 = sphi %s787_s14, %s917_s14   ;;  %s748_s13 = sphi %s785_s13, %s916_s13   ;;  %s744_s12 = sphi %s783_s12, %s915_s12  }
   0x4   : > { %p26_p0 = scmp.ge.s32.totalorder %s25_s17, 3  ;;  %p626_p1 = scmp.ge.s32.totalorder %s760_s16, 1 }
   0x5   : > { %p171_p2 = scmp.lt.s32.totalorder %s760_s16, 49 }
   0x6   : > { %s920_s17 = smov (%p26_p0, %s25_s17), 0  ;;  %s922_s18 = smov (!%p26_p0, %s28_s18), %s756_s15 }
   0x7   : > { %p172_p3 = pnand %p626_p1, %p171_p2  ;;  %p30_p4 = scmp.ge.s32.totalorder %s922_s18, 16 }
   0x8   : > { %s201_s19 = sadd.s32 (!%p172_p3), %s744_s12, %s748_s13  ;;  %p211_p5 = scmp.lt.s32.totalorder (!%p172_p3), %s748_s13, 15 }
   0x9   : > { %s924_s18 = smov (%p30_p4, %s922_s18), 0  ;;  %175 = sbr.rel (%p172_p3) target bundleno = 273 (0x111), region = 32 }
   0xa   : > { %p202_p6 = scmp.lt.s32.totalorder (!%p172_p3), %s201_s19, 17  ;;  %p629_p7 = scmp.ne.s32.totalorder (!%p172_p3), %s744_s12, 0 }
   0xe   : > { %s926_s13 = smov (!%p211_p5, %s748_s13), 15  ;;  %s928_s19 = smov (!%p202_p6, %s201_s19), 17 }
   0xf   : > { %s676_s20 = sshll.u32 %s926_s13, 5  ;;  %s679_s21 = smul.u32 18, %s928_s19 }
  0x10   : > { %s819_s24 = scalar_lea.vmem %s914_s3, %s676_s20  ;;  %222 = sbr.rel (%p629_p7) target bundleno = 26 (0x1a), region = 36 }
  0x11   : > { %s824_s27 = scalar_lea.vmem %s911_s0, %s679_s21 }
  0x15   : > { %v762_v0 = vmov 0.0  }
  0x16   : > { %223 = vst [vmem:[#allocation2 + $0x10] sm:$0xff] %v762_v0 }
  0x17   : > { %224 = vst [vmem:[#allocation2] sm:$0xff] %v762_v0 }
  0x18   : > { %225 = vst [vmem:[#allocation2 + $0x18] sm:$0xff] %v762_v0 }
  0x19   : > { %226 = vst [vmem:[#allocation2 + $0x8] sm:$0xff] %v762_v0 }
  0x1a PF: > { %s677_s28 = smul.u32 6, %s744_s12  ;;  %v231_v1 = vld [vmem:[%s824_s27] sm:$0x1]  ;;  %vm297_vm0 = vcmask 1041408   ;;  %v232_v2 = vld [vmem:[%s824_s27 + $0x1] sm:$0x1] }
  0x1b   : > { %v233_v3 = vld [vmem:[%s824_s27 + $0x2] sm:$0x1]  ;;  %v234_v4 = vld [vmem:[%s824_s27 + $0x3] sm:$0x1]  ;;  %252 = vst [vmem:[#allocation1] ss:$9 sm:$0xff] %v231_v1 }
  0x1c   : > { %s249_s4 = scalar_lea.vmem %s912_s1, %s677_s28  ;;  %v235_v9 = vld [vmem:[%s824_s27 + $0x4] sm:$0x1]  ;;  %255 = vst [vmem:[#allocation1 + $0x1] ss:$9 sm:$0xff] %v232_v2  ;;  %v236_v10 = vld [vmem:[%s824_s27 + $0x5] sm:$0x1] }
  0x1d   : > { %v250_v5 = vld [vmem:[%s249_s4] sm:$0x3]  ;;  %v650_v6 = vld [vmem:[%s249_s4 + $0x2] sm:$0x3]  ;;  %258 = vst [vmem:[#allocation1 + $0x2] ss:$9 sm:$0xff] %v233_v3 }
  0x1e   : > { %v299_v7 = vsel %vm297_vm0, %v250_v5, 0  ;;  %v391_v8 = vsel %vm297_vm0, %v650_v6, 0  ;;  %v237_v11 = vld [vmem:[%s824_s27 + $0x6] sm:$0x1]  ;;  %261 = vst [vmem:[#allocation1 + $0x3] ss:$9 sm:$0xff] %v234_v4 }
  0x1f   : > { %308 = vmatpush.bf16.msra.mxu0 %v299_v7  ;;  %400 = vmatpush.bf16.msra.mxu1 %v391_v8  ;;  %v238_v12 = vld [vmem:[%s824_s27 + $0x7] sm:$0x1]  ;;  %264 = vst [vmem:[#allocation1 + $0x4] ss:$9 sm:$0xff] %v235_v9  ;;  %vm292_vm1 = vcmask 31744   ;;  %v227_v62 = vld [vmem:[#allocation2 + $0x10] sm:$0xff] }
  0x20   : > { %678 = vmatpush.bf16.msra.mxu3 %v299_v7  ;;  %267 = vst [vmem:[#allocation1 + $0x5] ss:$9 sm:$0xff] %v236_v10  ;;  %v239_v13 = vld [vmem:[%s824_s27 + $0x8] sm:$0x1]  ;;  %v240_v14 = vld [vmem:[%s824_s27 + $0x9] sm:$0x1] }
  0x21   : > { %270 = vst [vmem:[#allocation1 + $0x6] ss:$9 sm:$0xff] %v237_v11  ;;  %v670_v15 = vld [vmem:[%s249_s4 + $0x4] sm:$0x3]  ;;  %v241_v17 = vld [vmem:[%s824_s27 + $0xa] sm:$0x1] }
  0x22   : > { %273 = vst [vmem:[#allocation1 + $0x7] ss:$9 sm:$0xff] %v238_v12  ;;  %v483_v18 = vsel %vm297_vm0, %v670_v15, 0  ;;  %v242_v19 = vld [vmem:[%s824_s27 + $0xb] sm:$0x1]  ;;  %v229_v8 = vld [vmem:[#allocation2 + $0x18] sm:$0xff] }
  0x23   : > { %492 = vmatpush.bf16.msra.mxu2 %v483_v18  ;;  %v243_v20 = vld [vmem:[%s824_s27 + $0xc] sm:$0x1]  ;;  %v244_v21 = vld [vmem:[%s824_s27 + $0xd] sm:$0x1]  ;;  %v245_v22 = vld [vmem:[%s824_s27 + $0xe] sm:$0x1] }
  0x24   : > { %v246_v23 = vld [vmem:[%s824_s27 + $0xf] sm:$0x1]  ;;  %v633_v24 = vld [vmem:[%s824_s27 + $0x1] sm:$0x1]  ;;  %v634_v25 = vld [vmem:[%s824_s27 + $0x2] sm:$0x1] }
  0x25   : > { %v635_v27 = vld [vmem:[%s824_s27 + $0x3] sm:$0x1]  ;;  %v636_v28 = vld [vmem:[%s824_s27 + $0x4] sm:$0x1]  ;;  %v637_v29 = vld [vmem:[%s824_s27 + $0x5] sm:$0x1] }
  0x26   : > { %v638_v30 = vld [vmem:[%s824_s27 + $0x6] sm:$0x1]  ;;  %v639_v31 = vld [vmem:[%s824_s27 + $0x7] sm:$0x1]  ;;  %v640_v32 = vld [vmem:[%s824_s27 + $0x8] sm:$0x1] }
  0x27   : > { %v641_v33 = vld [vmem:[%s824_s27 + $0x9] sm:$0x1]  ;;  %v642_v34 = vld [vmem:[%s824_s27 + $0xa] sm:$0x1]  ;;  %v643_v36 = vld [vmem:[%s824_s27 + $0xb] sm:$0x1] }
  0x28   : > { %v644_v37 = vld [vmem:[%s824_s27 + $0xc] sm:$0x1]  ;;  %v645_v38 = vld [vmem:[%s824_s27 + $0xd] sm:$0x1]  ;;  %v646_v39 = vld [vmem:[%s824_s27 + $0xe] sm:$0x1] }
  0x29   : > { %v274_v16 = vld [vmem:[#allocation1] sm:$0xff]  ;;  %v647_v40 = vld [vmem:[%s824_s27 + $0xf] sm:$0x1]  ;;  %v648_v41 = vld [vmem:[%s824_s27 + $0x10] sm:$0x1]  ;;  %p673_p8 = scmp.ne.s32.totalorder %s744_s12, 2 }
  0x2a   : > { %631 = vmatmul.msk.bf16.vlgmr.msra.gmra.mxu0 %vm292_vm1, %v274_v16  ;;  %276 = vst [vmem:[#allocation1] ss:$9 sm:$0xff] %v239_v13  ;;  %v653_v42 = vld [vmem:[%s824_s27 + $0x2] sm:$0x1]  ;;  %v654_v43 = vld [vmem:[%s824_s27 + $0x3] sm:$0x1] }
  0x2b   : > { %278 = vst [vmem:[#allocation1 + $0x1] ss:$9 sm:$0xff] %v240_v14  ;;  %v655_v45 = vld [vmem:[%s824_s27 + $0x4] sm:$0x1]  ;;  %v656_v46 = vld [vmem:[%s824_s27 + $0x5] sm:$0x1] }
  0x2c   : > { %280 = vst [vmem:[#allocation1 + $0x2] ss:$9 sm:$0xff] %v241_v17  ;;  %v657_v47 = vld [vmem:[%s824_s27 + $0x6] sm:$0x1]  ;;  %v658_v48 = vld [vmem:[%s824_s27 + $0x7] sm:$0x1] }
  0x2d   : > { %282 = vst [vmem:[#allocation1 + $0x3] ss:$9 sm:$0xff] %v242_v19  ;;  %v659_v49 = vld [vmem:[%s824_s27 + $0x8] sm:$0x1]  ;;  %v660_v50 = vld [vmem:[%s824_s27 + $0x9] sm:$0x1] }
  0x2e   : > { %284 = vst [vmem:[#allocation1 + $0x4] ss:$9 sm:$0xff] %v243_v20  ;;  %v661_v51 = vld [vmem:[%s824_s27 + $0xa] sm:$0x1]  ;;  %v662_v52 = vld [vmem:[%s824_s27 + $0xb] sm:$0x1] }
  0x2f   : > { %286 = vst [vmem:[#allocation1 + $0x5] ss:$9 sm:$0xff] %v244_v21  ;;  %v663_v54 = vld [vmem:[%s824_s27 + $0xc] sm:$0x1]  ;;  %v664_v55 = vld [vmem:[%s824_s27 + $0xd] sm:$0x1] }
  0x30   : > { %288 = vst [vmem:[#allocation1 + $0x6] ss:$9 sm:$0xff] %v245_v22  ;;  %v665_v56 = vld [vmem:[%s824_s27 + $0xe] sm:$0x1]  ;;  %v666_v57 = vld [vmem:[%s824_s27 + $0xf] sm:$0x1] }
  0x31   : > { %290 = vst [vmem:[#allocation1 + $0x7] ss:$9 sm:$0xff] %v246_v23  ;;  %v667_v58 = vld [vmem:[%s824_s27 + $0x10] sm:$0x1]  ;;  %v668_v59 = vld [vmem:[%s824_s27 + $0x11] sm:$0x1] }
  0x32   : > { %v228_v3 = vld [vmem:[#allocation2] sm:$0xff]  ;;  %v230_v16 = vld [vmem:[#allocation2 + $0x8] sm:$0xff] }
  0x38   : > { %v291_v26 = vld [vmem:[#allocation1] sm:$0xff] }
  0x39   : > { %346 = vst [vmem:[#allocation1] ss:$9 sm:$0xff] %v633_v24  ;;  %632 = vmatmul.msk.bf16.vlgmr.msra.gmra.mxu3 %vm292_vm1, %v291_v26 }
  0x3a   : > { %349 = vst [vmem:[#allocation1 + $0x1] ss:$9 sm:$0xff] %v634_v25 }
  0x3b   : > { %352 = vst [vmem:[#allocation1 + $0x2] ss:$9 sm:$0xff] %v635_v27 }
  0x3c   : > { %355 = vst [vmem:[#allocation1 + $0x3] ss:$9 sm:$0xff] %v636_v28 }
  0x3d   : > { %358 = vst [vmem:[#allocation1 + $0x4] ss:$9 sm:$0xff] %v637_v29 }
  0x3e   : > { %361 = vst [vmem:[#allocation1 + $0x5] ss:$9 sm:$0xff] %v638_v30 }
  0x3f   : > { %364 = vst [vmem:[#allocation1 + $0x6] ss:$9 sm:$0xff] %v639_v31 }
  0x40   : > { %367 = vst [vmem:[#allocation1 + $0x7] ss:$9 sm:$0xff] %v640_v32 }
  0x47   : > { %v368_v35 = vld [vmem:[#allocation1] sm:$0xff] }
  0x48   : > { %651 = vmatmul.msk.bf16.vlgmr.msra.gmra.mxu1 %vm292_vm1, %v368_v35  ;;  %370 = vst [vmem:[#allocation1] ss:$9 sm:$0xff] %v641_v33 }
  0x49   : > { %372 = vst [vmem:[#allocation1 + $0x1] ss:$9 sm:$0xff] %v642_v34 }
  0x4a   : > { %374 = vst [vmem:[#allocation1 + $0x2] ss:$9 sm:$0xff] %v643_v36 }
  0x4b   : > { %376 = vst [vmem:[#allocation1 + $0x3] ss:$9 sm:$0xff] %v644_v37 }
  0x4c   : > { %378 = vst [vmem:[#allocation1 + $0x4] ss:$9 sm:$0xff] %v645_v38 }
  0x4d   : > { %380 = vst [vmem:[#allocation1 + $0x5] ss:$9 sm:$0xff] %v646_v39 }
  0x4e   : > { %382 = vst [vmem:[#allocation1 + $0x6] ss:$9 sm:$0xff] %v647_v40 }
  0x4f   : > { %384 = vst [vmem:[#allocation1 + $0x7] ss:$9 sm:$0xff] %v648_v41 }
  0x56   : > { %v385_v44 = vld [vmem:[#allocation1] sm:$0xff] }
  0x57   : > { %438 = vst [vmem:[#allocation1] ss:$9 sm:$0xff] %v653_v42 }
  0x58   : > { %441 = vst [vmem:[#allocation1 + $0x1] ss:$9 sm:$0xff] %v654_v43  ;;  %652 = vmatmul.msk.bf16.gmra.mxu1 %vm292_vm1, %v385_v44 }
  0x59   : > { %444 = vst [vmem:[#allocation1 + $0x2] ss:$9 sm:$0xff] %v655_v45 }
  0x5a   : > { %447 = vst [vmem:[#allocation1 + $0x3] ss:$9 sm:$0xff] %v656_v46 }
  0x5b   : > { %450 = vst [vmem:[#allocation1 + $0x4] ss:$9 sm:$0xff] %v657_v47 }
  0x5c   : > { %453 = vst [vmem:[#allocation1 + $0x5] ss:$9 sm:$0xff] %v658_v48 }
  0x5d   : > { %456 = vst [vmem:[#allocation1 + $0x6] ss:$9 sm:$0xff] %v659_v49 }
  0x5e   : > { %459 = vst [vmem:[#allocation1 + $0x7] ss:$9 sm:$0xff] %v660_v50 }
  0x65   : > { %v460_v53 = vld [vmem:[#allocation1] sm:$0xff] }
  0x66   : > { %671 = vmatmul.msk.bf16.vlgmr.msra.gmra.mxu2 %vm292_vm1, %v460_v53  ;;  %462 = vst [vmem:[#allocation1] ss:$9 sm:$0xff] %v661_v51 }
  0x67   : > { %464 = vst [vmem:[#allocation1 + $0x1] ss:$9 sm:$0xff] %v662_v52 }
  0x68   : > { %466 = vst [vmem:[#allocation1 + $0x2] ss:$9 sm:$0xff] %v663_v54 }
  0x69   : > { %468 = vst [vmem:[#allocation1 + $0x3] ss:$9 sm:$0xff] %v664_v55 }
  0x6a   : > { %470 = vst [vmem:[#allocation1 + $0x4] ss:$9 sm:$0xff] %v665_v56 }
  0x6b   : > { %472 = vst [vmem:[#allocation1 + $0x5] ss:$9 sm:$0xff] %v666_v57 }
  0x6c   : > { %474 = vst [vmem:[#allocation1 + $0x6] ss:$9 sm:$0xff] %v667_v58 }
  0x6d   : > { %476 = vst [vmem:[#allocation1 + $0x7] ss:$9 sm:$0xff] %v668_v59 }
  0x74   : > { %v477_v60 = vld [vmem:[#allocation1] sm:$0xff] }
  0x76   : > { %672 = vmatmul.msk.bf16.gmra.mxu2 %vm292_vm1, %v477_v60 }
  0xa7   : > { %v310_v61 = vpop.f32.mrf.mxu0 }
  0xa8   : > { %v320_v0 = vadd.f32 %v310_v61, %v227_v62 }
  0xaf   : > { %v312_v2 = vpop.f32.mrf.mxu0 }
  0xb0   : > { %v321_v7 = vadd.f32 %v312_v2, %v228_v3 }
  0xbc   : > { %v315_v9 = vpop.f32.mrf.mxu3 }
  0xbd   : > { %v322_v12 = vadd.f32 %v315_v9, %v229_v8 }
  0xc4   : > { %v317_v17 = vpop.f32.mrf.mxu3 }
  0xc5   : > { %v402_v63 = vpop.f32.mrf.mxu1  ;;  %v323_v20 = vadd.f32 %v317_v17, %v230_v16 }
  0xc6   : > { %v412_v1 = vadd.f32 %v402_v63, %v320_v0 }
  0xcd   : > { %v404_v4 = vpop.f32.mrf.mxu1 }
  0xce   : > { %v413_v10 = vadd.f32 %v404_v4, %v321_v7 }
  0xd5   : > { %v407_v14 = vpop.f32.mrf.mxu1 }
  0xd6   : > { %v414_v15 = vadd.f32 %v407_v14, %v322_v12 }
  0xdd   : > { %v409_v21 = vpop.f32.mrf.mxu1 }
  0xde   : > { %v415_v22 = vadd.f32 %v409_v21, %v323_v20 }
  0xe9   : > { %v494_v5 = vpop.f32.mrf.mxu2 }
  0xea   : > { %v504_v6 = vadd.f32 %v494_v5, %v412_v1 }
  0xec   : > { %508 = vst [vmem:[#allocation2 + $0x10] sm:$0xff] %v504_v6 }
  0xf1   : > { %v496_v11 = vpop.f32.mrf.mxu2 }
  0xf2   : > { %v505_v13 = vadd.f32 %v496_v11, %v413_v10 }
  0xf4   : > { %509 = vst [vmem:[#allocation2] sm:$0xff] %v505_v13 }
  0xf9   : > { %v499_v18 = vpop.f32.mrf.mxu2 }
  0xfa   : > { %v506_v19 = vadd.f32 %v499_v18, %v414_v15 }
  0xfc   : > { %510 = vst [vmem:[#allocation2 + $0x18] sm:$0xff] %v506_v19 }
 0x100   : > { %515 = sbr.rel (%p673_p8) target bundleno = 273 (0x111), region = 40 }
 0x101   : > { %v501_v23 = vpop.f32.mrf.mxu2 }
 0x102   : > { %v507_v24 = vadd.f32 %v501_v23, %v415_v22 }
 0x104   : > { %511 = vst [vmem:[#allocation2 + $0x8] sm:$0xff] %v507_v24 }
 0x105   : > { %v516_v25 = vld [vmem:[#allocation2 + $0x10] sm:$0xff]  ;;  %v721_v26 = vld [vmem:[%s913_s2] ss:$0 sm:$0xff]  ;;  %v517_v27 = vld [vmem:[#allocation2] sm:$0xff] }
 0x106   : > { %v518_v28 = vld [vmem:[#allocation2 + $0x18] sm:$0xff]  ;;  %v524_v30 = vadd.f32 %v721_v26, %v516_v25  ;;  %v525_v31 = vadd.f32 %v721_v26, %v517_v27 }
 0x107   : > { %v526_v32 = vadd.f32 %v721_v26, %v518_v28 }
 0x108   : > { %v528_v34 = vmax.f32 %v524_v30, 0.0  ;;  %v529_v35 = vmax.f32 %v525_v31, 0.0 }
 0x109   : > { %v530_v36 = vmax.f32 %v526_v32, 0.0 }
 0x10a   : > { %532 = vst [vmem:[%s819_s24] sm:$0xff] %v528_v34 }
 0x10b   : > { %v519_v29 = vld [vmem:[#allocation2 + $0x8] sm:$0xff]  ;;  %533 = vst [vmem:[%s819_s24 + $0x8] sm:$0xff] %v529_v35 }
 0x10c   : > { %v527_v33 = vadd.f32 %v721_v26, %v519_v29  ;;  %534 = vst [vmem:[%s819_s24 + $0x10] sm:$0xff] %v530_v36 }
 0x10e   : > { %v531_v37 = vmax.f32 %v527_v33, 0.0 }
 0x110   : > { %535 = vst [vmem:[%s819_s24 + $0x18] sm:$0xff] %v531_v37 }
 0x111 PF: > { %s13_s16 = sadd.s32 1, %s760_s16   ;;  %s915_s12 = smov %s752_s14 }
 0x112   : > { %p10_p9 = scmp.ge.s32.totalorder %s13_s16, 50   ;;  %s916_s13 = smov %s756_s15 }
 0x113   : > { %s917_s14 = smov %s920_s17  ;;  %s918_s15 = smov %s924_s18 }
 0x114   :  { %12 = sbr.rel (!%p10_p9) target bundleno = 3 (0x3), region = 96 }

</bundles_post_ra>
